<compile_context>
chip_gen: v7x
topology: tpu7x:2x2x1
jax: 0.10.0
libtpu: 0.0.40
codegen_flags: <defaults>
</compile_context>

<pallas_src>
import functools

import jax
import jax.numpy as jnp
from jax.experimental import pallas as pl
from jax.experimental.pallas import tpu as pltpu
from jax.scipy.special import erf as _erf


_SQRT_HALF = 0.7071067811865476
_MAX_HIDDEN_CHUNK = 2048          # cap on per-iteration hidden slab (VMEM, v7x)
_VMEM_LIMIT_BYTES = 64 * 1024 * 1024


def _gelu_erf(x):
    """Exact (erf-based) GELU matching torch.nn.GELU() default.

    erf via Abramowitz & Stegun 7.1.26 polynomial (|err| < 1.5e-7). The divide is
    routed to the EUP with pl.reciprocal(approx=True) so the elementwise chain over
    the (rows, hidden) tile does not saturate the VALU slot.
    """
    z = x * _SQRT_HALF
    az = jnp.abs(z)
    t = pl.reciprocal(1.0 + 0.3275911 * az, approx=True)
    poly = ((((1.061405429 * t - 1.453152027) * t + 1.421413741) * t
             - 0.284496736) * t + 0.254829592) * t
    erf_abs = 1.0 - poly * jnp.exp(-az * az)
    erf_z = jnp.where(z < 0.0, -erf_abs, erf_abs)
    return 0.5 * x * (1.0 + erf_z)


def ffn_kernel(x_ref, g_ref, b_ref, w1_ref, b1_ref, w2_ref, b2_ref, o_ref, *,
               eps, h_chunk):
    """Fused LayerNorm -> Linear -> GELU -> Linear on one (tn, dim) row tile.

    x_ref : (tn, dim)         activation tile (math in f32)
    g_ref : (1, dim)   f32    LayerNorm gamma  (resident, single-buffered)
    b_ref : (1, dim)   f32    LayerNorm beta   (resident, single-buffered)
    w1_ref: (dim, hidden) bf16  Linear1 weight^T (resident)
    b1_ref: (1, hidden) f32   Linear1 bias
    w2_ref: (hidden, dim) bf16  Linear2 weight^T (resident)
    b2_ref: (1, dim)   f32    Linear2 bias
    o_ref : (tn, dim)         output tile
    """
    x = x_ref[...].astype(jnp.float32)

    # --- LayerNorm (biased variance, eps inside rsqrt) + affine, in f32 ---
    mean = jnp.mean(x, axis=-1, keepdims=True)
    xc = x - mean
    var = jnp.mean(xc * xc, axis=-1, keepdims=True)
    ln = xc * jax.lax.rsqrt(var + eps) * g_ref[...] + b_ref[...]
    ln_mx = ln.astype(w1_ref.dtype)                 # bf16 MXU operand

    # --- Linear1 -> GELU -> Linear2, chunked over the hidden dim so the
    #     (tn, hidden) f32 intermediate is never materialized all at once. ---
    hidden = w1_ref.shape[1]
    n_chunks = hidden // h_chunk
    y = None
    for c in range(n_chunks):                       # static trip count (unrolled)
        sl = slice(c * h_chunk, (c + 1) * h_chunk)  # 128-lane-aligned static slice
        h = jnp.dot(ln_mx, w1_ref[:, sl], preferred_element_type=jnp.float32)
        h = _gelu_erf(h + b1_ref[:, sl])
        # TODO(synk): nn.Dropout is identity at the module default p=0.0 (and eval);
        # training-mode dropout would need pltpu.prng_seed + pltpu.stateful_bernoulli.
        part = jnp.dot(h.astype(w2_ref.dtype), w2_ref[sl, :],
                       preferred_element_type=jnp.float32)
        y = part if y is None else y + part

    o_ref[...] = (y + b2_ref[...]).astype(o_ref.dtype)


def prepare_ffn_params(gamma, beta, w1, b1, w2, b2, *, mxu_dtype=jnp.bfloat16):
    """One-time parameter prep: weight transpose + bf16 cast + bias reshape.

    Do this once at parameter-load time (not per forward call) so no HBM
    transpose/cast copies of the weights are emitted on every call.
    """
    dim = gamma.shape[-1]
    hidden, dim_in = w1.shape
    assert dim_in == dim and w2.shape == (dim, hidden)
    return {
        "gamma": gamma.astype(jnp.float32).reshape(1, dim),
        "beta": beta.astype(jnp.float32).reshape(1, dim),
        "w1t": jnp.transpose(w1).astype(mxu_dtype),     # (dim, hidden)
        "b1": b1.astype(jnp.float32).reshape(1, hidden),
        "w2t": jnp.transpose(w2).astype(mxu_dtype),     # (hidden, dim)
        "b2": b2.astype(jnp.float32).reshape(1, dim),
    }


def _row_tile(n_rows, tn_req, gran, min_steps=4):
    """Row tile: multiple of `gran` sublanes, as big as requested, but capped so the
    1-D parallel grid keeps >= min_steps steps whenever the row count allows it."""
    tn_req = max(gran, (int(tn_req) // gran) * gran)
    n_up = pl.cdiv(int(n_rows), gran) * gran
    tn = min(tn_req, n_up)
    if n_up >= min_steps * gran:
        cap = max(gran, (n_up // min_steps) // gran * gran)
        tn = min(tn, cap)
    return max(gran, tn)


def _build_ffn_call(n, dim, hidden, tn, h_chunk, eps, out_dtype, single_buffer):
    def const_spec(shape):
        rank = len(shape)
        index_map = lambda i, _r=rank: (0,) * _r
        if single_buffer:
            # Grid-invariant operand: no double buffering (halves resident VMEM).
            return pl.BlockSpec(shape, index_map, pipeline_mode=pl.Buffered(1))
        return pl.BlockSpec(shape, index_map)

    grid = (pl.cdiv(n, tn),)
    return pl.pallas_call(
        functools.partial(ffn_kernel, eps=float(eps), h_chunk=int(h_chunk)),
        out_shape=jax.ShapeDtypeStruct((n, dim), out_dtype),
        grid_spec=pltpu.PrefetchScalarGridSpec(
            num_scalar_prefetch=0,
            grid=grid,
            in_specs=[
                pl.BlockSpec((tn, dim), lambda i: (i, 0)),   # activation row tile
                const_spec((1, dim)),                        # gamma   (resident)
                const_spec((1, dim)),                        # beta    (resident)
                const_spec((dim, hidden)),                   # W1^T    (resident bf16)
                const_spec((1, hidden)),                     # b1      (resident)
                const_spec((hidden, dim)),                   # W2^T    (resident bf16)
                const_spec((1, dim)),                        # b2      (resident)
            ],
            out_specs=pl.BlockSpec((tn, dim), lambda i: (i, 0)),
        ),
        compiler_params=pltpu.CompilerParams(
            dimension_semantics=("parallel",),
            vmem_limit_bytes=_VMEM_LIMIT_BYTES,
        ),
    )


def feed_forward(x, params, *, eps=1e-5, tn=1024, h_chunk=None):
    """FeedForward.forward. x: (..., dim). `params` from prepare_ffn_params()."""
    orig_shape = x.shape
    dim = orig_shape[-1]
    dim_w, hidden = params["w1t"].shape
    assert dim == dim_w, "Linear1 in_features must equal input dim"
    assert params["w2t"].shape == (hidden, dim)

    # Hidden-dim chunk: full hidden when small, else 128-lane-aligned slabs.
    if h_chunk is None:
        h_chunk = hidden if hidden <= _MAX_HIDDEN_CHUNK else _MAX_HIDDEN_CHUNK
    h_chunk = int(h_chunk)
    if hidden % h_chunk != 0 or (h_chunk != hidden and h_chunk % 128 != 0):
        h_chunk = hidden    # fall back to unchunked if alignment cannot be met

    x2d = x.reshape(-1, dim)
    n = x2d.shape[0]
    gran = 16 if x2d.dtype == jnp.bfloat16 else 8   # packed-row granularity (bf16)
    tn = _row_tile(n, tn, gran)

    # No wrapper-side pad / slice: grid = cdiv(n, tn); Pallas masks the partial
    # last row block on load and store (row-independent math, so garbage rows in
    # the padded region never contaminate valid rows).
    args = (x2d, params["gamma"], params["beta"], params["w1t"], params["b1"],
            params["w2t"], params["b2"])
    try:
        out = _build_ffn_call(n, dim, hidden, tn, h_chunk, eps, x.dtype,
                              single_buffer=True)(*args)
    except Exception:
        # Fallback if this JAX build rejects pl.Buffered(1) single-buffering.
        out = _build_ffn_call(n, dim, hidden, tn, h_chunk, eps, x.dtype,
                              single_buffer=False)(*args)
    return out.reshape(orig_shape)


def _reference_ffn(x, gamma, beta, w1, b1, w2, b2, eps=1e-5):
    """Pure-JAX f32 reference matching the PyTorch module (exact erf GELU)."""
    x = x.astype(jnp.float32)
    mean = jnp.mean(x, axis=-1, keepdims=True)
    var = jnp.mean((x - mean) ** 2, axis=-1, keepdims=True)
    ln = (x - mean) * jax.lax.rsqrt(var + eps) * gamma + beta
    h = ln @ w1.T + b1
    h = 0.5 * h * (1.0 + _erf(h * _SQRT_HALF))
    return h @ w2.T + b2


if __name__ == "__main__":
    def _run_case(key, B, S, DIM, HIDDEN, tn, h_chunk):
        kx, kg, kb, kw1, kb1, kw2, kb2 = jax.random.split(key, 7)
        x = jax.random.normal(kx, (B, S, DIM), dtype=jnp.float32)
        gamma = 1.0 + 0.1 * jax.random.normal(kg, (DIM,), jnp.float32)
        beta = 0.1 * jax.random.normal(kb, (DIM,), jnp.float32)
        lim1 = 1.0 / (DIM ** 0.5)                    # torch nn.Linear default init
        w1 = jax.random.uniform(kw1, (HIDDEN, DIM), jnp.float32, -lim1, lim1)
        b1 = jax.random.uniform(kb1, (HIDDEN,), jnp.float32, -lim1, lim1)
        lim2 = 1.0 / (HIDDEN ** 0.5)
        w2 = jax.random.uniform(kw2, (DIM, HIDDEN), jnp.float32, -lim2, lim2)
        b2 = jax.random.uniform(kb2, (DIM,), jnp.float32, -lim2, lim2)

        params = prepare_ffn_params(gamma, beta, w1, b1, w2, b2)  # once, hoisted
        y = feed_forward(x, params, tn=tn, h_chunk=h_chunk)
        y = jax.block_until_ready(y)

        ref = _reference_ffn(x, gamma, beta, w1, b1, w2, b2)
        assert y.shape == x.shape and y.dtype == x.dtype
        max_err = float(jnp.max(jnp.abs(y - ref)))
        # bf16 MXU operands + approx-reciprocal erf => compare at bf16-level tolerance.
        assert jnp.allclose(y, ref, atol=5e-2, rtol=5e-2), f"max abs err {max_err}"

    key = jax.random.PRNGKey(0)
    k1, k2 = jax.random.split(key)
    # Case 1: module's nominal toy size FeedForward(dim=32, hidden_dim=128), (B,S)=(2,8).
    _run_case(k1, 2, 8, 32, 128, tn=1024, h_chunk=None)
    # Case 2: remainder rows (partial last block, no wrapper pad) + hidden chunking.
    _run_case(k2, 2, 9, 32, 256, tn=16, h_chunk=128)

    print("KERNEL_OK")
</pallas_src>

<mosaic_0001>
module attributes {stable_mosaic.version = 11 : i64} {
  func.func @ffn_kernel(%arg0: i32, %arg1: memref<16x32xf32, #tpu.memory_space<vmem>>, %arg2: memref<1x32xf32, #tpu.memory_space<vmem>>, %arg3: memref<1x32xf32, #tpu.memory_space<vmem>>, %arg4: memref<32x128xbf16, #tpu.memory_space<vmem>>, %arg5: memref<1x128xf32, #tpu.memory_space<vmem>>, %arg6: memref<128x32xbf16, #tpu.memory_space<vmem>>, %arg7: memref<1x32xf32, #tpu.memory_space<vmem>>, %arg8: memref<16x32xf32, #tpu.memory_space<vmem>>) attributes {dimension_semantics = [#tpu.dimension_semantics<parallel>], iteration_bounds = array<i64: 1>, scalar_prefetch = 0 : i64, scratch_operands = 0 : i64, tpu.core_type = #tpu.core_type<tc>, window_params = [{transform_indices = @transform_0, window_bounds = array<i64: 16, 32>}, {pipeline_mode = #tpu.pipeline_mode<synchronous>, transform_indices = @transform_1, window_bounds = array<i64: 1, 32>}, {pipeline_mode = #tpu.pipeline_mode<synchronous>, transform_indices = @transform_2, window_bounds = array<i64: 1, 32>}, {pipeline_mode = #tpu.pipeline_mode<synchronous>, transform_indices = @transform_3, window_bounds = array<i64: 32, 128>}, {pipeline_mode = #tpu.pipeline_mode<synchronous>, transform_indices = @transform_4, window_bounds = array<i64: 1, 128>}, {pipeline_mode = #tpu.pipeline_mode<synchronous>, transform_indices = @transform_5, window_bounds = array<i64: 128, 32>}, {pipeline_mode = #tpu.pipeline_mode<synchronous>, transform_indices = @transform_6, window_bounds = array<i64: 1, 32>}, {transform_indices = @transform_7, window_bounds = array<i64: 16, 32>}]} {
    %c0 = arith.constant 0 : index
    %c0_0 = arith.constant 0 : index
    %0 = vector.load %arg1[%c0, %c0_0] : memref<16x32xf32, #tpu.memory_space<vmem>>, vector<16x32xf32>
    %cst = arith.constant dense<0.000000e+00> : vector<16xf32>
    %1 = vector.multi_reduction <add>, %0, %cst [1] : vector<16x32xf32> to vector<16xf32>
    %2 = vector.shape_cast %1 : vector<16xf32> to vector<16x1xf32>
    %cst_1 = arith.constant 3.200000e+01 : f32
    %3 = vector.broadcast %cst_1 : f32 to vector<16x1xf32>
    %4 = arith.divf %2, %3 : vector<16x1xf32>
    %5 = vector.broadcast %4 : vector<16x1xf32> to vector<16x32xf32>
    %6 = arith.subf %0, %5 : vector<16x32xf32>
    %7 = arith.mulf %6, %6 : vector<16x32xf32>
    %cst_2 = arith.constant dense<0.000000e+00> : vector<16xf32>
    %8 = vector.multi_reduction <add>, %7, %cst_2 [1] : vector<16x32xf32> to vector<16xf32>
    %9 = vector.shape_cast %8 : vector<16xf32> to vector<16x1xf32>
    %cst_3 = arith.constant 3.200000e+01 : f32
    %10 = vector.broadcast %cst_3 : f32 to vector<16x1xf32>
    %11 = arith.divf %9, %10 : vector<16x1xf32>
    %cst_4 = arith.constant 9.99999974E-6 : f32
    %12 = vector.broadcast %cst_4 : f32 to vector<16x1xf32>
    %13 = arith.addf %11, %12 : vector<16x1xf32>
    %14 = math.rsqrt %13 : vector<16x1xf32>
    %15 = vector.broadcast %14 : vector<16x1xf32> to vector<16x32xf32>
    %16 = arith.mulf %6, %15 : vector<16x32xf32>
    %c0_5 = arith.constant 0 : index
    %c0_6 = arith.constant 0 : index
    %17 = vector.load %arg2[%c0_5, %c0_6] : memref<1x32xf32, #tpu.memory_space<vmem>>, vector<1x32xf32>
    %18 = vector.broadcast %17 : vector<1x32xf32> to vector<16x32xf32>
    %19 = arith.mulf %16, %18 : vector<16x32xf32>
    %c0_7 = arith.constant 0 : index
    %c0_8 = arith.constant 0 : index
    %20 = vector.load %arg3[%c0_7, %c0_8] : memref<1x32xf32, #tpu.memory_space<vmem>>, vector<1x32xf32>
    %21 = vector.broadcast %20 : vector<1x32xf32> to vector<16x32xf32>
    %22 = arith.addf %19, %21 : vector<16x32xf32>
    %23 = arith.truncf %22 : vector<16x32xf32> to vector<16x32xbf16>
    %c0_9 = arith.constant 0 : index
    %c0_10 = arith.constant 0 : index
    %24 = vector.load %arg4[%c0_9, %c0_10] : memref<32x128xbf16, #tpu.memory_space<vmem>>, vector<32x128xbf16>
    %cst_11 = arith.constant dense<0.000000e+00> : vector<16x128xf32>
    %25 = tpu.matmul %23, %24, %cst_11 {dimension_numbers = #tpu.dot_dimension_numbers<[1], [0], [0], [1], [0, 0, 1, 1], [], []>} : vector<16x32xbf16>, vector<32x128xbf16>, vector<16x128xf32> -> vector<16x128xf32>
    %c0_12 = arith.constant 0 : index
    %c0_13 = arith.constant 0 : index
    %26 = vector.load %arg5[%c0_12, %c0_13] : memref<1x128xf32, #tpu.memory_space<vmem>>, vector<1x128xf32>
    %27 = vector.broadcast %26 : vector<1x128xf32> to vector<16x128xf32>
    %28 = arith.addf %25, %27 : vector<16x128xf32>
    %cst_14 = arith.constant 0.707106769 : f32
    %29 = vector.broadcast %cst_14 : f32 to vector<16x128xf32>
    %30 = arith.mulf %28, %29 : vector<16x128xf32>
    %31 = math.absf %30 : vector<16x128xf32>
    %cst_15 = arith.constant 0.327591091 : f32
    %32 = vector.broadcast %cst_15 : f32 to vector<16x128xf32>
    %33 = arith.mulf %32, %31 : vector<16x128xf32>
    %cst_16 = arith.constant 1.000000e+00 : f32
    %34 = vector.broadcast %cst_16 : f32 to vector<16x128xf32>
    %35 = arith.addf %34, %33 : vector<16x128xf32>
    %36 = tpu.reciprocal %35 {approx = true} : vector<16x128xf32> -> vector<16x128xf32>
    %cst_17 = arith.constant 1.06140542 : f32
    %37 = vector.broadcast %cst_17 : f32 to vector<16x128xf32>
    %38 = arith.mulf %37, %36 : vector<16x128xf32>
    %cst_18 = arith.constant 1.45315206 : f32
    %39 = vector.broadcast %cst_18 : f32 to vector<16x128xf32>
    %40 = arith.subf %38, %39 : vector<16x128xf32>
    %41 = arith.mulf %40, %36 : vector<16x128xf32>
    %cst_19 = arith.constant 1.42141378 : f32
    %42 = vector.broadcast %cst_19 : f32 to vector<16x128xf32>
    %43 = arith.addf %41, %42 : vector<16x128xf32>
    %44 = arith.mulf %43, %36 : vector<16x128xf32>
    %cst_20 = arith.constant 0.284496725 : f32
    %45 = vector.broadcast %cst_20 : f32 to vector<16x128xf32>
    %46 = arith.subf %44, %45 : vector<16x128xf32>
    %47 = arith.mulf %46, %36 : vector<16x128xf32>
    %cst_21 = arith.constant 0.254829586 : f32
    %48 = vector.broadcast %cst_21 : f32 to vector<16x128xf32>
    %49 = arith.addf %47, %48 : vector<16x128xf32>
    %50 = arith.mulf %49, %36 : vector<16x128xf32>
    %cst_22 = arith.constant 0.000000e+00 : f32
    %51 = vector.broadcast %cst_22 : f32 to vector<16x128xf32>
    %52 = arith.subf %51, %31 : vector<16x128xf32>
    %53 = arith.mulf %52, %31 : vector<16x128xf32>
    %54 = math.exp %53 : vector<16x128xf32>
    %55 = arith.mulf %50, %54 : vector<16x128xf32>
    %cst_23 = arith.constant 1.000000e+00 : f32
    %56 = vector.broadcast %cst_23 : f32 to vector<16x128xf32>
    %57 = arith.subf %56, %55 : vector<16x128xf32>
    %cst_24 = arith.constant 0.000000e+00 : f32
    %58 = vector.broadcast %cst_24 : f32 to vector<16x128xf32>
    %59 = arith.cmpf olt, %30, %58 : vector<16x128xf32>
    %cst_25 = arith.constant 0.000000e+00 : f32
    %60 = vector.broadcast %cst_25 : f32 to vector<16x128xf32>
    %61 = arith.subf %60, %57 : vector<16x128xf32>
    %62 = arith.select %59, %61, %57 : vector<16x128xi1>, vector<16x128xf32>
    %cst_26 = arith.constant 5.000000e-01 : f32
    %63 = vector.broadcast %cst_26 : f32 to vector<16x128xf32>
    %64 = arith.mulf %63, %28 : vector<16x128xf32>
    %cst_27 = arith.constant 1.000000e+00 : f32
    %65 = vector.broadcast %cst_27 : f32 to vector<16x128xf32>
    %66 = arith.addf %65, %62 : vector<16x128xf32>
    %67 = arith.mulf %64, %66 : vector<16x128xf32>
    %68 = arith.truncf %67 : vector<16x128xf32> to vector<16x128xbf16>
    %c0_28 = arith.constant 0 : index
    %c0_29 = arith.constant 0 : index
    %69 = vector.load %arg6[%c0_28, %c0_29] : memref<128x32xbf16, #tpu.memory_space<vmem>>, vector<128x32xbf16>
    %cst_30 = arith.constant dense<0.000000e+00> : vector<16x32xf32>
    %70 = tpu.matmul %68, %69, %cst_30 {dimension_numbers = #tpu.dot_dimension_numbers<[1], [0], [0], [1], [0, 0, 1, 1], [], []>} : vector<16x128xbf16>, vector<128x32xbf16>, vector<16x32xf32> -> vector<16x32xf32>
    %c0_31 = arith.constant 0 : index
    %c0_32 = arith.constant 0 : index
    %71 = vector.load %arg7[%c0_31, %c0_32] : memref<1x32xf32, #tpu.memory_space<vmem>>, vector<1x32xf32>
    %72 = vector.broadcast %71 : vector<1x32xf32> to vector<16x32xf32>
    %73 = arith.addf %70, %72 : vector<16x32xf32>
    %c0_33 = arith.constant 0 : index
    %c0_34 = arith.constant 0 : index
    %74 = vector.load %arg8[%c0_33, %c0_34] : memref<16x32xf32, #tpu.memory_space<vmem>>, vector<16x32xf32>
    tpu.vector_store %arg8[%c0_33, %c0_34], %73 {strides = array<i32>} : memref<16x32xf32, #tpu.memory_space<vmem>>, vector<16x32xf32>,
    return
  }
  func.func @transform_0(%arg0: i32) -> (i32, i32) {
    %c0_i32 = arith.constant 0 : i32
    %c0_i32_0 = arith.constant 0 : i32
    return %arg0, %c0_i32 : i32, i32
  }
  func.func @transform_1(%arg0: i32) -> (i32, i32) {
    %c0_i32 = arith.constant 0 : i32
    %c0_i32_0 = arith.constant 0 : i32
    %c0_i32_1 = arith.constant 0 : i32
    return %c0_i32, %c0_i32_0 : i32, i32
  }
  func.func @transform_2(%arg0: i32) -> (i32, i32) {
    %c0_i32 = arith.constant 0 : i32
    %c0_i32_0 = arith.constant 0 : i32
    %c0_i32_1 = arith.constant 0 : i32
    return %c0_i32, %c0_i32_0 : i32, i32
  }
  func.func @transform_3(%arg0: i32) -> (i32, i32) {
    %c0_i32 = arith.constant 0 : i32
    %c0_i32_0 = arith.constant 0 : i32
    %c0_i32_1 = arith.constant 0 : i32
    return %c0_i32, %c0_i32_0 : i32, i32
  }
  func.func @transform_4(%arg0: i32) -> (i32, i32) {
    %c0_i32 = arith.constant 0 : i32
    %c0_i32_0 = arith.constant 0 : i32
    %c0_i32_1 = arith.constant 0 : i32
    return %c0_i32, %c0_i32_0 : i32, i32
  }
  func.func @transform_5(%arg0: i32) -> (i32, i32) {
    %c0_i32 = arith.constant 0 : i32
    %c0_i32_0 = arith.constant 0 : i32
    %c0_i32_1 = arith.constant 0 : i32
    return %c0_i32, %c0_i32_0 : i32, i32
  }
  func.func @transform_6(%arg0: i32) -> (i32, i32) {
    %c0_i32 = arith.constant 0 : i32
    %c0_i32_0 = arith.constant 0 : i32
    %c0_i32_1 = arith.constant 0 : i32
    return %c0_i32, %c0_i32_0 : i32, i32
  }
  func.func @transform_7(%arg0: i32) -> (i32, i32) {
    %c0_i32 = arith.constant 0 : i32
    %c0_i32_0 = arith.constant 0 : i32
    return %arg0, %c0_i32 : i32, i32
  }
}

module attributes {stable_mosaic.version = 11 : i64} {
  func.func @ffn_kernel(%arg0: i32, %arg1: memref<16x32xf32, #tpu.memory_space<vmem>>, %arg2: memref<1x32xf32, #tpu.memory_space<vmem>>, %arg3: memref<1x32xf32, #tpu.memory_space<vmem>>, %arg4: memref<32x128xbf16, #tpu.memory_space<vmem>>, %arg5: memref<1x128xf32, #tpu.memory_space<vmem>>, %arg6: memref<128x32xbf16, #tpu.memory_space<vmem>>, %arg7: memref<1x32xf32, #tpu.memory_space<vmem>>, %arg8: memref<16x32xf32, #tpu.memory_space<vmem>>) attributes {dimension_semantics = [#tpu.dimension_semantics<parallel>], iteration_bounds = array<i64: 1>, scalar_prefetch = 0 : i64, scratch_operands = 0 : i64, tpu.core_type = #tpu.core_type<tc>, window_params = [{transform_indices = @transform_0, window_bounds = array<i64: 16, 32>}, {pipeline_mode = #tpu.pipeline_mode<synchronous>, transform_indices = @transform_1, window_bounds = array<i64: 1, 32>}, {pipeline_mode = #tpu.pipeline_mode<synchronous>, transform_indices = @transform_2, window_bounds = array<i64: 1, 32>}, {pipeline_mode = #tpu.pipeline_mode<synchronous>, transform_indices = @transform_3, window_bounds = array<i64: 32, 128>}, {pipeline_mode = #tpu.pipeline_mode<synchronous>, transform_indices = @transform_4, window_bounds = array<i64: 1, 128>}, {pipeline_mode = #tpu.pipeline_mode<synchronous>, transform_indices = @transform_5, window_bounds = array<i64: 128, 32>}, {pipeline_mode = #tpu.pipeline_mode<synchronous>, transform_indices = @transform_6, window_bounds = array<i64: 1, 32>}, {transform_indices = @transform_7, window_bounds = array<i64: 16, 32>}]} {
    %c0 = arith.constant 0 : index
    %c0_0 = arith.constant 0 : index
    %0 = vector.load %arg1[%c0, %c0_0] : memref<16x32xf32, #tpu.memory_space<vmem>>, vector<16x32xf32>
    %cst = arith.constant dense<0.000000e+00> : vector<16xf32>
    %1 = vector.multi_reduction <add>, %0, %cst [1] : vector<16x32xf32> to vector<16xf32>
    %2 = vector.shape_cast %1 : vector<16xf32> to vector<16x1xf32>
    %cst_1 = arith.constant 3.200000e+01 : f32
    %3 = vector.broadcast %cst_1 : f32 to vector<16x1xf32>
    %4 = arith.divf %2, %3 : vector<16x1xf32>
    %5 = vector.broadcast %4 : vector<16x1xf32> to vector<16x32xf32>
    %6 = arith.subf %0, %5 : vector<16x32xf32>
    %7 = arith.mulf %6, %6 : vector<16x32xf32>
    %cst_2 = arith.constant dense<0.000000e+00> : vector<16xf32>
    %8 = vector.multi_reduction <add>, %7, %cst_2 [1] : vector<16x32xf32> to vector<16xf32>
    %9 = vector.shape_cast %8 : vector<16xf32> to vector<16x1xf32>
    %cst_3 = arith.constant 3.200000e+01 : f32
    %10 = vector.broadcast %cst_3 : f32 to vector<16x1xf32>
    %11 = arith.divf %9, %10 : vector<16x1xf32>
    %cst_4 = arith.constant 9.99999974E-6 : f32
    %12 = vector.broadcast %cst_4 : f32 to vector<16x1xf32>
    %13 = arith.addf %11, %12 : vector<16x1xf32>
    %14 = math.rsqrt %13 : vector<16x1xf32>
    %15 = vector.broadcast %14 : vector<16x1xf32> to vector<16x32xf32>
    %16 = arith.mulf %6, %15 : vector<16x32xf32>
    %c0_5 = arith.constant 0 : index
    %c0_6 = arith.constant 0 : index
    %17 = vector.load %arg2[%c0_5, %c0_6] : memref<1x32xf32, #tpu.memory_space<vmem>>, vector<1x32xf32>
    %18 = vector.broadcast %17 : vector<1x32xf32> to vector<16x32xf32>
    %19 = arith.mulf %16, %18 : vector<16x32xf32>
    %c0_7 = arith.constant 0 : index
    %c0_8 = arith.constant 0 : index
    %20 = vector.load %arg3[%c0_7, %c0_8] : memref<1x32xf32, #tpu.memory_space<vmem>>, vector<1x32xf32>
    %21 = vector.broadcast %20 : vector<1x32xf32> to vector<16x32xf32>
    %22 = arith.addf %19, %21 : vector<16x32xf32>
    %23 = arith.truncf %22 : vector<16x32xf32> to vector<16x32xbf16>
    %c0_9 = arith.constant 0 : index
    %c0_10 = arith.constant 0 : index
    %24 = vector.load %arg4[%c0_9, %c0_10] : memref<32x128xbf16, #tpu.memory_space<vmem>>, vector<32x128xbf16>
    %cst_11 = arith.constant dense<0.000000e+00> : vector<16x128xf32>
    %25 = tpu.matmul %23, %24, %cst_11 {dimension_numbers = #tpu.dot_dimension_numbers<[1], [0], [0], [1], [0, 0, 1, 1], [], []>} : vector<16x32xbf16>, vector<32x128xbf16>, vector<16x128xf32> -> vector<16x128xf32>
    %c0_12 = arith.constant 0 : index
    %c0_13 = arith.constant 0 : index
    %26 = vector.load %arg5[%c0_12, %c0_13] : memref<1x128xf32, #tpu.memory_space<vmem>>, vector<1x128xf32>
    %27 = vector.broadcast %26 : vector<1x128xf32> to vector<16x128xf32>
    %28 = arith.addf %25, %27 : vector<16x128xf32>
    %cst_14 = arith.constant 0.707106769 : f32
    %29 = vector.broadcast %cst_14 : f32 to vector<16x128xf32>
    %30 = arith.mulf %28, %29 : vector<16x128xf32>
    %31 = math.absf %30 : vector<16x128xf32>
    %cst_15 = arith.constant 0.327591091 : f32
    %32 = vector.broadcast %cst_15 : f32 to vector<16x128xf32>
    %33 = arith.mulf %32, %31 : vector<16x128xf32>
    %cst_16 = arith.constant 1.000000e+00 : f32
    %34 = vector.broadcast %cst_16 : f32 to vector<16x128xf32>
    %35 = arith.addf %34, %33 : vector<16x128xf32>
    %36 = tpu.reciprocal %35 {approx = true} : vector<16x128xf32> -> vector<16x128xf32>
    %cst_17 = arith.constant 1.06140542 : f32
    %37 = vector.broadcast %cst_17 : f32 to vector<16x128xf32>
    %38 = arith.mulf %37, %36 : vector<16x128xf32>
    %cst_18 = arith.constant 1.45315206 : f32
    %39 = vector.broadcast %cst_18 : f32 to vector<16x128xf32>
    %40 = arith.subf %38, %39 : vector<16x128xf32>
    %41 = arith.mulf %40, %36 : vector<16x128xf32>
    %cst_19 = arith.constant 1.42141378 : f32
    %42 = vector.broadcast %cst_19 : f32 to vector<16x128xf32>
    %43 = arith.addf %41, %42 : vector<16x128xf32>
    %44 = arith.mulf %43, %36 : vector<16x128xf32>
    %cst_20 = arith.constant 0.284496725 : f32
    %45 = vector.broadcast %cst_20 : f32 to vector<16x128xf32>
    %46 = arith.subf %44, %45 : vector<16x128xf32>
    %47 = arith.mulf %46, %36 : vector<16x128xf32>
    %cst_21 = arith.constant 0.254829586 : f32
    %48 = vector.broadcast %cst_21 : f32 to vector<16x128xf32>
    %49 = arith.addf %47, %48 : vector<16x128xf32>
    %50 = arith.mulf %49, %36 : vector<16x128xf32>
    %cst_22 = arith.constant 0.000000e+00 : f32
    %51 = vector.broadcast %cst_22 : f32 to vector<16x128xf32>
    %52 = arith.subf %51, %31 : vector<16x128xf32>
    %53 = arith.mulf %52, %31 : vector<16x128xf32>
    %54 = math.exp %53 : vector<16x128xf32>
    %55 = arith.mulf %50, %54 : vector<16x128xf32>
    %cst_23 = arith.constant 1.000000e+00 : f32
    %56 = vector.broadcast %cst_23 : f32 to vector<16x128xf32>
    %57 = arith.subf %56, %55 : vector<16x128xf32>
    %cst_24 = arith.constant 0.000000e+00 : f32
    %58 = vector.broadcast %cst_24 : f32 to vector<16x128xf32>
    %59 = arith.cmpf olt, %30, %58 : vector<16x128xf32>
    %cst_25 = arith.constant 0.000000e+00 : f32
    %60 = vector.broadcast %cst_25 : f32 to vector<16x128xf32>
    %61 = arith.subf %60, %57 : vector<16x128xf32>
    %62 = arith.select %59, %61, %57 : vector<16x128xi1>, vector<16x128xf32>
    %cst_26 = arith.constant 5.000000e-01 : f32
    %63 = vector.broadcast %cst_26 : f32 to vector<16x128xf32>
    %64 = arith.mulf %63, %28 : vector<16x128xf32>
    %cst_27 = arith.constant 1.000000e+00 : f32
    %65 = vector.broadcast %cst_27 : f32 to vector<16x128xf32>
    %66 = arith.addf %65, %62 : vector<16x128xf32>
    %67 = arith.mulf %64, %66 : vector<16x128xf32>
    %68 = arith.truncf %67 : vector<16x128xf32> to vector<16x128xbf16>
    %c0_28 = arith.constant 0 : index
    %c0_29 = arith.constant 0 : index
    %69 = vector.load %arg6[%c0_28, %c0_29] : memref<128x32xbf16, #tpu.memory_space<vmem>>, vector<128x32xbf16>
    %cst_30 = arith.constant dense<0.000000e+00> : vector<16x32xf32>
    %70 = tpu.matmul %68, %69, %cst_30 {dimension_numbers = #tpu.dot_dimension_numbers<[1], [0], [0], [1], [0, 0, 1, 1], [], []>} : vector<16x128xbf16>, vector<128x32xbf16>, vector<16x32xf32> -> vector<16x32xf32>
    %c0_31 = arith.constant 0 : index
    %c0_32 = arith.constant 0 : index
    %71 = vector.load %arg7[%c0_31, %c0_32] : memref<1x32xf32, #tpu.memory_space<vmem>>, vector<1x32xf32>
    %72 = vector.broadcast %71 : vector<1x32xf32> to vector<16x32xf32>
    %73 = arith.addf %70, %72 : vector<16x32xf32>
    %c0_33 = arith.constant 0 : index
    %c0_34 = arith.constant 0 : index
    %74 = vector.load %arg8[%c0_33, %c0_34] : memref<16x32xf32, #tpu.memory_space<vmem>>, vector<16x32xf32>
    tpu.vector_store %arg8[%c0_33, %c0_34], %73 {strides = array<i32>} : memref<16x32xf32, #tpu.memory_space<vmem>>, vector<16x32xf32>,
    return
  }
  func.func @transform_0(%arg0: i32) -> (i32, i32) {
    %c0_i32 = arith.constant 0 : i32
    %c0_i32_0 = arith.constant 0 : i32
    return %arg0, %c0_i32 : i32, i32
  }
  func.func @transform_1(%arg0: i32) -> (i32, i32) {
    %c0_i32 = arith.constant 0 : i32
    %c0_i32_0 = arith.constant 0 : i32
    %c0_i32_1 = arith.constant 0 : i32
    return %c0_i32, %c0_i32_0 : i32, i32
  }
  func.func @transform_2(%arg0: i32) -> (i32, i32) {
    %c0_i32 = arith.constant 0 : i32
    %c0_i32_0 = arith.constant 0 : i32
    %c0_i32_1 = arith.constant 0 : i32
    return %c0_i32, %c0_i32_0 : i32, i32
  }
  func.func @transform_3(%arg0: i32) -> (i32, i32) {
    %c0_i32 = arith.constant 0 : i32
    %c0_i32_0 = arith.constant 0 : i32
    %c0_i32_1 = arith.constant 0 : i32
    return %c0_i32, %c0_i32_0 : i32, i32
  }
  func.func @transform_4(%arg0: i32) -> (i32, i32) {
    %c0_i32 = arith.constant 0 : i32
    %c0_i32_0 = arith.constant 0 : i32
    %c0_i32_1 = arith.constant 0 : i32
    return %c0_i32, %c0_i32_0 : i32, i32
  }
  func.func @transform_5(%arg0: i32) -> (i32, i32) {
    %c0_i32 = arith.constant 0 : i32
    %c0_i32_0 = arith.constant 0 : i32
    %c0_i32_1 = arith.constant 0 : i32
    return %c0_i32, %c0_i32_0 : i32, i32
  }
  func.func @transform_6(%arg0: i32) -> (i32, i32) {
    %c0_i32 = arith.constant 0 : i32
    %c0_i32_0 = arith.constant 0 : i32
    %c0_i32_1 = arith.constant 0 : i32
    return %c0_i32, %c0_i32_0 : i32, i32
  }
  func.func @transform_7(%arg0: i32) -> (i32, i32) {
    %c0_i32 = arith.constant 0 : i32
    %c0_i32_0 = arith.constant 0 : i32
    return %arg0, %c0_i32 : i32, i32
  }
}

</mosaic_0001>

<bundles_post_ra>
// kernel: tpu_custom_call.1
= control target key start
LH: loop header
LB: loop body
LE: loop exit
PB: predicated region body
PF: predicated region fallthrough
CT: control target
= control target key end

     0   :  { %12 = vsyncpa [#allocation3], 0  ;;  %s876_s0 = inlined_call_operand.hbm [shape: f32[16,32], index: 0, kind: input, shape index: {}]   ;;  %s877_s1 = inlined_call_operand.hbm [shape: f32[1,32], index: 1, kind: input, shape index: {}]   ;;  %s878_s2 = inlined_call_operand.hbm [shape: f32[1,32], index: 2, kind: input, shape index: {}]   ;;  %s879_s3 = inlined_call_operand.hbm [shape: bf16[32,128], index: 3, kind: input, shape index: {}]   ;;  %s880_s4 = inlined_call_operand.hbm [shape: f32[1,128], index: 4, kind: input, shape index: {}]   ;;  %s881_s5 = inlined_call_operand.hbm [shape: bf16[128,32], index: 5, kind: input, shape index: {}]   ;;  %s882_s6 = inlined_call_operand.hbm [shape: f32[1,32], index: 6, kind: input, shape index: {}]   ;;  %s883_s7 = inlined_call_operand.hbm [shape: f32[16,32], index: 7, kind: output, shape index: {}]  }
   0x1   :  { %13 = vsyncpa [#allocation6], 0 }
   0x2   :  { %14 = vsyncpa [#allocation9], 0 }
   0x3   :  { %15 = vsyncpa [#allocation12], 0 }
   0x4   :  { %16 = vsyncpa [#allocation4], 0  ;;  %s699_s24 = smov [#allocation5]   ;;  %s700_s26 = smov [#allocation8]  }
   0x5   :  { %s35_s25 = sshll.u32 %s699_s24, 4  ;;  %s54_s27 = sshll.u32 %s700_s26, 4  ;;  %s36_s25 = int_to_ptr.vmem [resolvable:$true] %s35_s25  ;;  %s753_s27 = int_to_ptr.vmem [resolvable:$true] %s54_s27 }
   0x6   :  { %s513_s30 = scalar_lea.hbm %s877_s1, 16 }
   0x7   :  { %p514_p0 = scmp.ne.s32.totalorder %s877_s1, %s513_s30  ;;  %p517_p1 = scmp.lt.u32.totalorder %s513_s30, %s877_s1 }
   0x9   :  { %p519_p2 = pnand %p517_p1, %p514_p0 }
   0xb   :  { %522 = shalt.err (!%p519_p2)
}
   0xc   :  { %s523_s12 = scalar_lea.vmem %s36_s25, 16  ;;  %s527_s13 = scalar_lea.vmem %s36_s25, 32 }
   0xd   :  { %p524_p3 = scmp.ne.s32.totalorder %s36_s25, %s523_s12  ;;  %p528_p4 = scmp.lt.s32.totalorder %s36_s25, %s36_s25 }
   0xe   :  { %p529_p5 = scmp.lt.s32.totalorder %s527_s13, %s523_s12 }
  0x10   :  { %p530_p6 = por %p529_p5, %p528_p4 }
  0x12   :  { %p531_p7 = pnand %p530_p6, %p524_p3 }
  0x14   :  { %534 = shalt.err (!%p531_p7)
}
  0x15   :  { %38 = dma.hbm_to_vmem [thread:$0]  %s877_s1, 16, %s36_s25, [#allocation6]  }
  0x16   :  { %s535_s18 = scalar_lea.hbm %s879_s3, 256 }
  0x17   :  { %p536_p8 = scmp.ne.s32.totalorder %s879_s3, %s535_s18  ;;  %p539_p9 = scmp.lt.u32.totalorder %s535_s18, %s879_s3 }
  0x19   :  { %p541_p10 = pnand %p539_p9, %p536_p8 }
  0x1b   :  { %544 = shalt.err (!%p541_p10)
}
  0x1c   :  { %s545_s23 = scalar_lea.vmem %s753_s27, 256  ;;  %p550_p12 = scmp.lt.s32.totalorder %s753_s27, %s753_s27 }
  0x1d   :  { %p546_p11 = scmp.ne.s32.totalorder %s753_s27, %s545_s23  ;;  %p551_p13 = scmp.lt.s32.totalorder %s545_s23, %s545_s23 }
  0x1f   :  { %p552_p0 = por %p551_p13, %p550_p12 }
  0x21   :  { %p553_p1 = pnand %p552_p0, %p546_p11 }
  0x23   :  { %556 = shalt.err (!%p553_p1)
}
  0x24   :  { %s701_s1 = smov 64   ;;  %s702_s24 = smov 4  }
  0x25   :  { %60 = dma.hbm_to_vmem [thread:$0]  %s879_s3, 256, %s753_s27, [#allocation9], %s701_s1, %s701_s1, %s702_s24  }
  0x26   :  { %s703_s28 = smov [#allocation11]   ;;  %s704_s30 = smov [#allocation2]  }
  0x27   :  { %s76_s29 = sshll.u32 %s703_s28, 4  ;;  %s22_s8 = sshll.u32 %s704_s30, 4  ;;  %s77_s29 = int_to_ptr.vmem [resolvable:$true] %s76_s29  ;;  %s784_s8 = int_to_ptr.vmem [resolvable:$true] %s22_s8 }
  0x28   :  { %s557_s11 = scalar_lea.hbm %s881_s5, 1024 }
  0x29   :  { %p558_p2 = scmp.ne.s32.totalorder %s881_s5, %s557_s11  ;;  %p561_p3 = scmp.lt.u32.totalorder %s557_s11, %s881_s5 }
  0x2b   :  { %p563_p4 = pnand %p561_p3, %p558_p2 }
  0x2d   :  { %566 = shalt.err (!%p563_p4)
}
  0x2e   :  { %s567_s3 = scalar_lea.vmem %s77_s29, 1024  ;;  %p572_p6 = scmp.lt.s32.totalorder %s77_s29, %s77_s29 }
  0x2f   :  { %p568_p5 = scmp.ne.s32.totalorder %s77_s29, %s567_s3  ;;  %p573_p7 = scmp.lt.s32.totalorder %s567_s3, %s567_s3 }
  0x31   :  { %p574_p8 = por %p573_p7, %p572_p6 }
  0x33   :  { %p575_p9 = pnand %p574_p8, %p568_p5 }
  0x35   :  { %578 = shalt.err (!%p575_p9)
}
  0x36   :  { %82 = dma.hbm_to_vmem [thread:$0]  %s881_s5, 1024, %s77_s29, [#allocation12], %s701_s1, %s701_s1, %s702_s24  }
  0x37   :  { %s579_s19 = scalar_lea.hbm %s876_s0, 256 }
  0x38   :  { %p580_p10 = scmp.ne.s32.totalorder %s876_s0, %s579_s19  ;;  %p583_p11 = scmp.lt.u32.totalorder %s579_s19, %s876_s0 }
  0x3a   :  { %p585_p12 = pnand %p583_p11, %p580_p10 }
  0x3c   :  { %588 = shalt.err (!%p585_p12)
}
  0x3d   :  { %s589_s25 = scalar_lea.vmem %s784_s8, 256  ;;  %p594_p0 = scmp.lt.s32.totalorder %s784_s8, %s784_s8 }
  0x3e   :  { %p590_p13 = scmp.ne.s32.totalorder %s784_s8, %s589_s25  ;;  %p595_p1 = scmp.lt.s32.totalorder %s589_s25, %s589_s25 }
  0x40   :  { %p596_p2 = por %p595_p1, %p594_p0 }
  0x42   :  { %p597_p3 = pnand %p596_p2, %p590_p13 }
  0x44   :  { %600 = shalt.err (!%p597_p3)
}
  0x45   :  { %s705_s5 = smov 128   ;;  %s706_s1 = smov 8  }
  0x46   :  { %28 = dma.hbm_to_vmem [thread:$0]  %s876_s0, 256, %s784_s8, [#allocation3], %s705_s5, %s705_s5, %s706_s1  }
  0x47   :  { %s707_s28 = smov [#allocation7]   ;;  %s708_s30 = smov [#allocation10]  }
  0x48   :  { %s45_s29 = sshll.u32 %s707_s28, 4  ;;  %s67_s9 = sshll.u32 %s708_s30, 4  ;;  %s46_s29 = int_to_ptr.vmem [resolvable:$true] %s45_s29  ;;  %s68_s9 = int_to_ptr.vmem [resolvable:$true] %s67_s9 }
  0x49   :  { %s601_s12 = scalar_lea.hbm %s878_s2, 16 }
  0x4a   :  { %p602_p4 = scmp.ne.s32.totalorder %s878_s2, %s601_s12  ;;  %p605_p5 = scmp.lt.u32.totalorder %s601_s12, %s878_s2 }
  0x4c   :  { %p607_p6 = pnand %p605_p5, %p602_p4 }
  0x4e   :  { %610 = shalt.err (!%p607_p6)
}
  0x4f   :  { %s611_s0 = scalar_lea.vmem %s46_s29, 16  ;;  %s615_s8 = scalar_lea.vmem %s46_s29, 32 }
  0x50   :  { %p612_p7 = scmp.ne.s32.totalorder %s46_s29, %s611_s0  ;;  %p616_p8 = scmp.lt.s32.totalorder %s46_s29, %s46_s29 }
  0x51   :  { %p617_p9 = scmp.lt.s32.totalorder %s615_s8, %s611_s0 }
  0x53   :  { %p618_p10 = por %p617_p9, %p616_p8 }
  0x55   :  { %p619_p11 = pnand %p618_p10, %p612_p7 }
  0x57   :  { %622 = shalt.err (!%p619_p11)
}
  0x58   :  { %48 = dma.hbm_to_vmem [thread:$0]  %s878_s2, 16, %s46_s29, [#allocation6]  }
  0x59   :  { %s623_s19 = scalar_lea.hbm %s880_s4, 16 }
  0x5a   :  { %p624_p12 = scmp.ne.s32.totalorder %s880_s4, %s623_s19  ;;  %p627_p13 = scmp.lt.u32.totalorder %s623_s19, %s880_s4 }
  0x5c   :  { %p629_p0 = pnand %p627_p13, %p624_p12 }
  0x5e   :  { %632 = shalt.err (!%p629_p0)
}
  0x5f   :  { %s633_s25 = scalar_lea.vmem %s68_s9, 16  ;;  %s637_s24 = scalar_lea.vmem %s68_s9, 32 }
  0x60   :  { %p634_p1 = scmp.ne.s32.totalorder %s68_s9, %s633_s25  ;;  %p638_p2 = scmp.lt.s32.totalorder %s68_s9, %s68_s9 }
  0x61   :  { %p639_p3 = scmp.lt.s32.totalorder %s637_s24, %s633_s25 }
  0x63   :  { %p640_p4 = por %p639_p3, %p638_p2 }
  0x65   :  { %p641_p5 = pnand %p640_p4, %p634_p1 }
  0x67   :  { %644 = shalt.err (!%p641_p5)
}
  0x68   :  { %70 = dma.hbm_to_vmem [thread:$0]  %s880_s4, 16, %s68_s9, [#allocation9]  }
  0x69   :  { %s709_s28 = smov [#allocation13]   ;;  %s645_s11 = scalar_lea.hbm %s882_s6, 16 }
  0x6a   :  { %s89_s29 = sshll.u32 %s709_s28, 4  ;;  %p646_p6 = scmp.ne.s32.totalorder %s882_s6, %s645_s11  ;;  %s90_s29 = int_to_ptr.vmem [resolvable:$true] %s89_s29 }
  0x6b   :  { %p649_p7 = scmp.lt.u32.totalorder %s645_s11, %s882_s6 }
  0x6d   :  { %p651_p8 = pnand %p649_p7, %p646_p6 }
  0x6f   :  { %654 = shalt.err (!%p651_p8)
}
  0x70   :  { %s655_s3 = scalar_lea.vmem %s90_s29, 16  ;;  %s659_s4 = scalar_lea.vmem %s90_s29, 32 }
  0x71   :  { %p656_p9 = scmp.ne.s32.totalorder %s90_s29, %s655_s3  ;;  %p660_p10 = scmp.lt.s32.totalorder %s90_s29, %s90_s29 }
  0x72   :  { %p661_p11 = scmp.lt.s32.totalorder %s659_s4, %s655_s3 }
  0x74   :  { %p662_p12 = por %p661_p11, %p660_p10 }
  0x76   :  { %p663_p13 = pnand %p662_p12, %p656_p9 }
  0x78   :  { %666 = shalt.err (!%p663_p13)
}
  0x79   :  { %92 = dma.hbm_to_vmem [thread:$0]  %s882_s6, 16, %s90_s29, [#allocation12]  }
  0x7a   :  { %689 = dma.done.wait [#allocation3], 256  }
  0x7b   :  { %690 = vsyncadd [#allocation3], 4294967040 }
  0x7c   :  { %691 = dma.done.wait [#allocation6], 32  }
  0x7d   :  { %692 = vsyncadd [#allocation6], 4294967264 }
  0x7e   :  { %693 = dma.done.wait [#allocation9], 272  }
  0x7f   :  { %694 = vsyncadd [#allocation9], 4294967024 }
  0x80   :  { %695 = dma.done.wait [#allocation12], 1040  }
  0x81   :  { %696 = vsyncadd [#allocation12], 4294966256  ;;  %vm117_vm0 = vcmask 261120   ;;  %v115_v0 = vld [vmem:[#allocation2] sm:$0xff]  ;;  %v116_v1 = vld [vmem:[#allocation2 + $0x8] sm:$0xff]  ;;  %v710_v15 = vmov 0.0  }
  0x82   :  { %v118_v2 = vsel %vm117_vm0, %v115_v0, 0.0  ;;  %v121_v3 = vsel %vm117_vm0, %v116_v1, 0.0  ;;  %v491_v14 = vld [vmem:[#allocation8] sm:$0xff]   ;;  %449 = vmatprep.subr.bf16.mxu0 %v710_v15  ;;  %457 = vmatprep.subr.bf16.mxu1 %v710_v15  ;;  %v492_v16 = vld [vmem:[#allocation8 + $0x8] sm:$0xff]   ;;  %vm711_vm1 = vmmov 0   ;;  %v493_v34 = vld [vmem:[#allocation11] sm:$0xff]  }
  0x83   :  { %119 = vadd.xlane.f32.xlu0 %v118_v2  ;;  %450 = vmatpush3.bf16.msra.mxu0 %v491_v14  ;;  %v418_v25 = vld [vmem:[#allocation5] ss:$0 sm:$0xff]  ;;  %v419_v29 = vld [vmem:[#allocation7] ss:$0 sm:$0xff]  ;;  %v495_v36 = vld [vmem:[#allocation11 + $0x10] sm:$0xff]   ;;  %s712_s6 = smov [#allocation14]  }
  0x84   :  { %453 = vmatprep.mubr.msk.bf16.mxu0 %vm711_vm1, %v710_v15  ;;  %451 = vmatprep.subr.bf16.mxu0 %v710_v15  ;;  %v494_v35 = vld [vmem:[#allocation11 + $0x8] sm:$0xff]   ;;  %v496_v37 = vld [vmem:[#allocation11 + $0x18] sm:$0xff]   ;;  %v497_v38 = vld [vmem:[#allocation11 + $0x20] sm:$0xff]   ;;  %s403_s8 = sshll.u32 %s712_s6, 4  ;;  %s404_s8 = int_to_ptr.vmem [resolvable:$true] %s403_s8 }
  0x85   :  { %473 = vmatprep.mubr.msk.bf16.mxu1 %vm711_vm1, %v710_v15  ;;  %458 = vmatpush3.bf16.msra.mxu1 %v493_v34  ;;  %v498_v39 = vld [vmem:[#allocation11 + $0x28] sm:$0xff]   ;;  %v499_v40 = vld [vmem:[#allocation11 + $0x30] sm:$0xff]   ;;  %v500_v41 = vld [vmem:[#allocation11 + $0x38] sm:$0xff]   ;;  %s667_s27 = scalar_lea.vmem %s404_s8, 256  ;;  %p672_p1 = scmp.lt.s32.totalorder %s404_s8, %s404_s8 }
  0x86   :  { %459 = vmatprep.subr.bf16.mxu1 %v710_v15  ;;  %v420_v42 = vld [vmem:[#allocation10] ss:$0 sm:$0xff]  ;;  %p668_p0 = scmp.ne.s32.totalorder %s404_s8, %s667_s27  ;;  %p673_p2 = scmp.lt.s32.totalorder %s667_s27, %s667_s27 }
  0x87   :  { %122 = vadd.xlane.f32.xlu0 %v121_v3  ;;  %452 = vmatpush3.bf16.msra.mxu0 %v492_v16 }
  0x88   :  { %p674_p3 = por %p673_p2, %p672_p1 }
  0x89   :  { %460 = vmatpush3.bf16.msra.mxu1 %v494_v35 }
  0x8a   :  { %461 = vmatprep.subr.bf16.mxu1 %v710_v15  ;;  %p675_p4 = pnand %p674_p3, %p668_p0 }
  0x8d   :  { %462 = vmatpush3.bf16.msra.mxu1 %v495_v36  ;;  %v428_v36 = vld [vmem:[#allocation13] ss:$0 sm:$0xff] }
  0x8e   :  { %463 = vmatprep.subr.bf16.mxu1 %v710_v15 }
  0x91   :  { %464 = vmatpush3.bf16.msra.mxu1 %v496_v37 }
  0x92   :  { %465 = vmatprep.subr.bf16.mxu1 %v710_v15 }
  0x95   :  { %466 = vmatpush3.bf16.msra.mxu1 %v497_v38 }
  0x96   :  { %467 = vmatprep.subr.bf16.mxu1 %v710_v15 }
  0x99   :  { %468 = vmatpush3.bf16.msra.mxu1 %v498_v39 }
  0x9a   :  { %469 = vmatprep.subr.bf16.mxu1 %v710_v15 }
  0x9d   :  { %470 = vmatpush3.bf16.msra.mxu1 %v499_v40 }
  0x9e   :  { %471 = vmatprep.subr.bf16.mxu1 %v710_v15 }
  0xa1   :  { %472 = vmatpush3.bf16.msra.mxu1 %v500_v41 }
 0x110   :  { %v120_v4 = vpop.xlane.xlu0 %119 }
 0x111   :  { %v125_v5 = vmul.f32 0.03125, %v120_v4 }
 0x113   :  { %v127_v6 = vsub.f32 %v115_v0, %v125_v5 }
 0x114   :  { %v123_v7 = vpop.xlane.xlu0 %122 }
 0x115   :  { %v126_v8 = vmul.f32 0.03125, %v123_v7  ;;  %v129_v9 = vmul.f32 %v127_v6, %v127_v6 }
 0x117   :  { %v128_v10 = vsub.f32 %v116_v1, %v126_v8  ;;  %v131_v11 = vsel %vm117_vm0, %v129_v9, 0.0 }
 0x118   :  { %132 = vadd.xlane.f32.xlu1 %v131_v11 }
 0x119   :  { %v130_v12 = vmul.f32 %v128_v10, %v128_v10 }
 0x11b   :  { %v134_v13 = vsel %vm117_vm0, %v130_v12, 0.0 }
 0x11c   :  { %135 = vadd.xlane.f32.xlu1 %v134_v13 }
 0x1a5   :  { %v133_v17 = vpop.xlane.xlu1 %132 }
 0x1a6   :  { %v137_v18 = vmul.f32 0.03125, %v133_v17 }
 0x1a8   :  { %v139_v19 = vadd.f32 1e-05, %v137_v18 }
 0x1a9   :  { %v136_v20 = vpop.xlane.xlu1 %135 }
 0x1aa   :  { %501 = vrsqrt.f32 %v139_v19  ;;  %v138_v21 = vmul.f32 0.03125, %v136_v20 }
 0x1ac   :  { %v140_v22 = vadd.f32 1e-05, %v138_v21 }
 0x1ae   :  { %503 = vrsqrt.f32 %v140_v22 }
 0x1b4   :  { %v502_v23 = vpop.eup %501 }
 0x1b5   :  { %v143_v24 = vmul.f32 %v502_v23, %v127_v6 }
 0x1b7   :  { %v152_v28 = vmul.f32 %v418_v25, %v143_v24 }
 0x1b8   :  { %v504_v26 = vpop.eup %503 }
 0x1b9   :  { %v144_v27 = vmul.f32 %v504_v26, %v128_v10  ;;  %v161_v31 = vadd.f32 %v419_v29, %v152_v28 }
 0x1bb   :  { %v153_v30 = vmul.f32 %v418_v25, %v144_v27 }
 0x1bd   :  { %v162_v32 = vadd.f32 %v419_v29, %v153_v30 }
 0x1bf   :  { %v163_v33 = vpack.c.bf16 %v162_v32, %v161_v31 }
 0x1c1   :  { %454 = vmatmul.mubr.msk.bf16.vlgmr.msra.gmra.mrb[0].mxu0 %vm117_vm0, %v163_v33 }
 0x294   :  { %v224_v43 = vpop.f32.mrb[0].mxu0 }
 0x295   :  { %v225_v44 = vadd.f32 %v420_v42, %v224_v43  ;;  %v455_v45 = vpop.f32.mrb[1].mxu0 }
 0x296   :  { %v227_v46 = vpop.f32.mrb[2].mxu0 }
 0x297   :  { %v231_v47 = vmul.f32 0.70710677, %v225_v44  ;;  %v228_v48 = vadd.f32 %v420_v42, %v227_v46  ;;  %v456_v49 = vpop.f32.mrb[3].mxu0  ;;  %v277_v30 = vmul.f32 0.5, %v225_v44 }
 0x299   :  { %v233_v50 = vand.u32 2147483647, %v231_v47  ;;  %v232_v51 = vmul.f32 0.70710677, %v228_v48  ;;  %vm271_vm2 = vcmp.lt.f32.partialorder %v231_v47, 0.0  ;;  %v278_v31 = vmul.f32 0.5, %v228_v48 }
 0x29b   :  { %v235_v52 = vmul.f32 0.3275911, %v233_v50  ;;  %v234_v53 = vand.u32 2147483647, %v232_v51  ;;  %v259_v57 = vsub.f32 0.0, %v233_v50  ;;  %vm272_vm3 = vcmp.lt.f32.partialorder %v232_v51, 0.0 }
 0x29d   :  { %v237_v54 = vadd.f32 1.0, %v235_v52  ;;  %v236_v55 = vmul.f32 0.3275911, %v234_v53  ;;  %v260_v58 = vsub.f32 0.0, %v234_v53  ;;  %v261_v60 = vmul.f32 %v259_v57, %v233_v50 }
 0x29f   :  { %505 = vrcp.f32 %v237_v54  ;;  %v238_v56 = vadd.f32 1.0, %v236_v55  ;;  %v262_v0 = vmul.f32 %v260_v58, %v234_v53  ;;  %v263_v1 = vmul.f32 1.442695, %v261_v60 }
 0x2a1   :  { %507 = vrcp.f32 %v238_v56  ;;  %v265_v6 = vmul.f32 1.442695, %v262_v0 }
 0x2a2   :  { %509 = vpow2.f32 %v263_v1 }
 0x2a3   :  { %511 = vpow2.f32 %v265_v6 }
 0x2a9   :  { %v506_v59 = vpop.eup %505 }
 0x2aa   :  { %v241_v61 = vmul.f32 1.0614054, %v506_v59 }
 0x2ab   :  { %v508_v62 = vpop.eup %507 }
 0x2ac   :  { %v424_v63 = vadd.f32 -1.4531521, %v241_v61  ;;  %v242_v2 = vmul.f32 1.0614054, %v508_v62  ;;  %v510_v17 = vpop.eup %509 }
 0x2ad   :  { %v512_v21 = vpop.eup %511 }
 0x2ae   :  { %v245_v3 = vmul.f32 %v506_v59, %v424_v63  ;;  %v425_v4 = vadd.f32 -1.4531521, %v242_v2 }
 0x2b0   :  { %v247_v5 = vadd.f32 1.4214138, %v245_v3  ;;  %v246_v7 = vmul.f32 %v508_v62, %v425_v4 }
 0x2b2   :  { %v249_v8 = vmul.f32 %v506_v59, %v247_v5  ;;  %v248_v9 = vadd.f32 1.4214138, %v246_v7 }
 0x2b4   :  { %v426_v10 = vadd.f32 -0.28449672, %v249_v8  ;;  %v250_v11 = vmul.f32 %v508_v62, %v248_v9 }
 0x2b6   :  { %v253_v12 = vmul.f32 %v506_v59, %v426_v10  ;;  %v427_v13 = vadd.f32 -0.28449672, %v250_v11 }
 0x2b8   :  { %v255_v14 = vadd.f32 0.2548296, %v253_v12  ;;  %v254_v15 = vmul.f32 %v508_v62, %v427_v13 }
 0x2ba   :  { %v257_v16 = vmul.f32 %v506_v59, %v255_v14  ;;  %v256_v18 = vadd.f32 0.2548296, %v254_v15 }
 0x2bc   :  { %v267_v19 = vmul.f32 %v510_v17, %v257_v16  ;;  %v258_v20 = vmul.f32 %v508_v62, %v256_v18 }
 0x2be   :  { %v269_v22 = vsub.f32 1.0, %v267_v19  ;;  %v268_v23 = vmul.f32 %v512_v21, %v258_v20 }
 0x2c0   :  { %v273_v24 = vsub.f32 0.0, %v269_v22  ;;  %v270_v25 = vsub.f32 1.0, %v268_v23 }
 0x2c2   :  { %v275_v26 = vsel %vm271_vm2, %v273_v24, %v269_v22  ;;  %v274_v27 = vsub.f32 0.0, %v270_v25 }
 0x2c3   :  { %v279_v28 = vadd.f32 1.0, %v275_v26 }
 0x2c4   :  { %v276_v29 = vsel %vm272_vm3, %v274_v27, %v270_v25 }
 0x2c5   :  { %v280_v32 = vadd.f32 1.0, %v276_v29  ;;  %v281_v33 = vmul.f32 %v279_v28, %v277_v30 }
 0x2c7   :  { %v282_v34 = vmul.f32 %v280_v32, %v278_v31 }
 0x2c9   :  { %v283_v35 = vpack.c.bf16 %v282_v34, %v281_v33 }
 0x2cb   :  { %474 = vmatmul.mubr.bf16.vlgmr.msra.gmra.mrb[0].mxu1 %v283_v35 }
 0x39e   :  { %v389_v37 = vpop.f32.mrb[0].mxu1 }
 0x39f   :  { %v390_v38 = vadd.f32 %v428_v36, %v389_v37  ;;  %v475_v39 = vpop.f32.mrb[1].mxu1 }
 0x3a0   :  { %v392_v40 = vpop.f32.mrb[2].mxu1 }
 0x3a1   :  { %396 = vst.msk [vmem:[#allocation14] sm:$0xff] %vm117_vm0, %v390_v38  ;;  %v393_v41 = vadd.f32 %v428_v36, %v392_v40  ;;  %v476_v42 = vpop.f32.mrb[3].mxu1 }
 0x3a3   :  { %397 = vst.msk [vmem:[#allocation14 + $0x8] sm:$0xff] %vm117_vm0, %v393_v41 }
 0x3a4   :  { %678 = shalt.err (!%p675_p4)
}
 0x3a5   :  { %s679_s18 = scalar_lea.hbm %s883_s7, 256 }
 0x3a6   :  { %p680_p5 = scmp.ne.s32.totalorder %s883_s7, %s679_s18  ;;  %p683_p6 = scmp.lt.u32.totalorder %s679_s18, %s883_s7 }
 0x3a8   :  { %p685_p7 = pnand %p683_p6, %p680_p5 }
 0x3aa   :  { %688 = shalt.err (!%p685_p7)
}
 0x3ab   :  { %409 = dma.vmem_to_hbm [thread:$0]  %s404_s8, 256, %s883_s7, [#allocation4], %s705_s5, %s705_s5, %s706_s1  }
 0x3ac   :  { %697 = dma.done.wait [#allocation4], 256  }
 0x3ad   :  { %698 = vsyncadd [#allocation4], 4294967040 }
 0x3ae   :  { %413 = vsyncpa [#allocation3], 1 }
 0x3af   :  { %414 = vsyncpa [#allocation6], 1 }
 0x3b0   :  { %415 = vsyncpa [#allocation9], 1 }
 0x3b1   :  { %416 = vsyncpa [#allocation12], 1 }
 0x3b2   :  { %417 = vsyncpa [#allocation4], 1 }

// kernel: tpu_custom_call.1
= control target key start
LH: loop header
LB: loop body
LE: loop exit
PB: predicated region body
PF: predicated region fallthrough
CT: control target
= control target key end

     0   :  { %12 = vsyncpa [#allocation3], 0  ;;  %s876_s0 = inlined_call_operand.hbm [shape: f32[16,32], index: 0, kind: input, shape index: {}]   ;;  %s877_s1 = inlined_call_operand.hbm [shape: f32[1,32], index: 1, kind: input, shape index: {}]   ;;  %s878_s2 = inlined_call_operand.hbm [shape: f32[1,32], index: 2, kind: input, shape index: {}]   ;;  %s879_s3 = inlined_call_operand.hbm [shape: bf16[32,128], index: 3, kind: input, shape index: {}]   ;;  %s880_s4 = inlined_call_operand.hbm [shape: f32[1,128], index: 4, kind: input, shape index: {}]   ;;  %s881_s5 = inlined_call_operand.hbm [shape: bf16[128,32], index: 5, kind: input, shape index: {}]   ;;  %s882_s6 = inlined_call_operand.hbm [shape: f32[1,32], index: 6, kind: input, shape index: {}]   ;;  %s883_s7 = inlined_call_operand.hbm [shape: f32[16,32], index: 7, kind: output, shape index: {}]  }
   0x1   :  { %13 = vsyncpa [#allocation6], 0 }
   0x2   :  { %14 = vsyncpa [#allocation9], 0 }
   0x3   :  { %15 = vsyncpa [#allocation12], 0 }
   0x4   :  { %16 = vsyncpa [#allocation4], 0  ;;  %s699_s24 = smov [#allocation5]   ;;  %s700_s26 = smov [#allocation8]  }
   0x5   :  { %s35_s25 = sshll.u32 %s699_s24, 4  ;;  %s54_s27 = sshll.u32 %s700_s26, 4  ;;  %s36_s25 = int_to_ptr.vmem [resolvable:$true] %s35_s25  ;;  %s753_s27 = int_to_ptr.vmem [resolvable:$true] %s54_s27 }
   0x6   :  { %s513_s30 = scalar_lea.hbm %s877_s1, 16 }
   0x7   :  { %p514_p0 = scmp.ne.s32.totalorder %s877_s1, %s513_s30  ;;  %p517_p1 = scmp.lt.u32.totalorder %s513_s30, %s877_s1 }
   0x9   :  { %p519_p2 = pnand %p517_p1, %p514_p0 }
   0xb   :  { %522 = shalt.err (!%p519_p2)
}
   0xc   :  { %s523_s12 = scalar_lea.vmem %s36_s25, 16  ;;  %s527_s13 = scalar_lea.vmem %s36_s25, 32 }
   0xd   :  { %p524_p3 = scmp.ne.s32.totalorder %s36_s25, %s523_s12  ;;  %p528_p4 = scmp.lt.s32.totalorder %s36_s25, %s36_s25 }
   0xe   :  { %p529_p5 = scmp.lt.s32.totalorder %s527_s13, %s523_s12 }
  0x10   :  { %p530_p6 = por %p529_p5, %p528_p4 }
  0x12   :  { %p531_p7 = pnand %p530_p6, %p524_p3 }
  0x14   :  { %534 = shalt.err (!%p531_p7)
}
  0x15   :  { %38 = dma.hbm_to_vmem [thread:$0]  %s877_s1, 16, %s36_s25, [#allocation6]  }
  0x16   :  { %s535_s18 = scalar_lea.hbm %s879_s3, 256 }
  0x17   :  { %p536_p8 = scmp.ne.s32.totalorder %s879_s3, %s535_s18  ;;  %p539_p9 = scmp.lt.u32.totalorder %s535_s18, %s879_s3 }
  0x19   :  { %p541_p10 = pnand %p539_p9, %p536_p8 }
  0x1b   :  { %544 = shalt.err (!%p541_p10)
}
  0x1c   :  { %s545_s23 = scalar_lea.vmem %s753_s27, 256  ;;  %p550_p12 = scmp.lt.s32.totalorder %s753_s27, %s753_s27 }
  0x1d   :  { %p546_p11 = scmp.ne.s32.totalorder %s753_s27, %s545_s23  ;;  %p551_p13 = scmp.lt.s32.totalorder %s545_s23, %s545_s23 }
  0x1f   :  { %p552_p0 = por %p551_p13, %p550_p12 }
  0x21   :  { %p553_p1 = pnand %p552_p0, %p546_p11 }
  0x23   :  { %556 = shalt.err (!%p553_p1)
}
  0x24   :  { %s701_s1 = smov 64   ;;  %s702_s24 = smov 4  }
  0x25   :  { %60 = dma.hbm_to_vmem [thread:$0]  %s879_s3, 256, %s753_s27, [#allocation9], %s701_s1, %s701_s1, %s702_s24  }
  0x26   :  { %s703_s28 = smov [#allocation11]   ;;  %s704_s30 = smov [#allocation2]  }
  0x27   :  { %s76_s29 = sshll.u32 %s703_s28, 4  ;;  %s22_s8 = sshll.u32 %s704_s30, 4  ;;  %s77_s29 = int_to_ptr.vmem [resolvable:$true] %s76_s29  ;;  %s784_s8 = int_to_ptr.vmem [resolvable:$true] %s22_s8 }
  0x28   :  { %s557_s11 = scalar_lea.hbm %s881_s5, 1024 }
  0x29   :  { %p558_p2 = scmp.ne.s32.totalorder %s881_s5, %s557_s11  ;;  %p561_p3 = scmp.lt.u32.totalorder %s557_s11, %s881_s5 }
  0x2b   :  { %p563_p4 = pnand %p561_p3, %p558_p2 }
  0x2d   :  { %566 = shalt.err (!%p563_p4)
}
  0x2e   :  { %s567_s3 = scalar_lea.vmem %s77_s29, 1024  ;;  %p572_p6 = scmp.lt.s32.totalorder %s77_s29, %s77_s29 }
  0x2f   :  { %p568_p5 = scmp.ne.s32.totalorder %s77_s29, %s567_s3  ;;  %p573_p7 = scmp.lt.s32.totalorder %s567_s3, %s567_s3 }
  0x31   :  { %p574_p8 = por %p573_p7, %p572_p6 }
  0x33   :  { %p575_p9 = pnand %p574_p8, %p568_p5 }
  0x35   :  { %578 = shalt.err (!%p575_p9)
}
  0x36   :  { %82 = dma.hbm_to_vmem [thread:$0]  %s881_s5, 1024, %s77_s29, [#allocation12], %s701_s1, %s701_s1, %s702_s24  }
  0x37   :  { %s579_s19 = scalar_lea.hbm %s876_s0, 256 }
  0x38   :  { %p580_p10 = scmp.ne.s32.totalorder %s876_s0, %s579_s19  ;;  %p583_p11 = scmp.lt.u32.totalorder %s579_s19, %s876_s0 }
  0x3a   :  { %p585_p12 = pnand %p583_p11, %p580_p10 }
  0x3c   :  { %588 = shalt.err (!%p585_p12)
}
  0x3d   :  { %s589_s25 = scalar_lea.vmem %s784_s8, 256  ;;  %p594_p0 = scmp.lt.s32.totalorder %s784_s8, %s784_s8 }
  0x3e   :  { %p590_p13 = scmp.ne.s32.totalorder %s784_s8, %s589_s25  ;;  %p595_p1 = scmp.lt.s32.totalorder %s589_s25, %s589_s25 }
  0x40   :  { %p596_p2 = por %p595_p1, %p594_p0 }
  0x42   :  { %p597_p3 = pnand %p596_p2, %p590_p13 }
  0x44   :  { %600 = shalt.err (!%p597_p3)
}
  0x45   :  { %s705_s5 = smov 128   ;;  %s706_s1 = smov 8  }
  0x46   :  { %28 = dma.hbm_to_vmem [thread:$0]  %s876_s0, 256, %s784_s8, [#allocation3], %s705_s5, %s705_s5, %s706_s1  }
  0x47   :  { %s707_s28 = smov [#allocation7]   ;;  %s708_s30 = smov [#allocation10]  }
  0x48   :  { %s45_s29 = sshll.u32 %s707_s28, 4  ;;  %s67_s9 = sshll.u32 %s708_s30, 4  ;;  %s46_s29 = int_to_ptr.vmem [resolvable:$true] %s45_s29  ;;  %s68_s9 = int_to_ptr.vmem [resolvable:$true] %s67_s9 }
  0x49   :  { %s601_s12 = scalar_lea.hbm %s878_s2, 16 }
  0x4a   :  { %p602_p4 = scmp.ne.s32.totalorder %s878_s2, %s601_s12  ;;  %p605_p5 = scmp.lt.u32.totalorder %s601_s12, %s878_s2 }
  0x4c   :  { %p607_p6 = pnand %p605_p5, %p602_p4 }
  0x4e   :  { %610 = shalt.err (!%p607_p6)
}
  0x4f   :  { %s611_s0 = scalar_lea.vmem %s46_s29, 16  ;;  %s615_s8 = scalar_lea.vmem %s46_s29, 32 }
  0x50   :  { %p612_p7 = scmp.ne.s32.totalorder %s46_s29, %s611_s0  ;;  %p616_p8 = scmp.lt.s32.totalorder %s46_s29, %s46_s29 }
  0x51   :  { %p617_p9 = scmp.lt.s32.totalorder %s615_s8, %s611_s0 }
  0x53   :  { %p618_p10 = por %p617_p9, %p616_p8 }
  0x55   :  { %p619_p11 = pnand %p618_p10, %p612_p7 }
  0x57   :  { %622 = shalt.err (!%p619_p11)
}
  0x58   :  { %48 = dma.hbm_to_vmem [thread:$0]  %s878_s2, 16, %s46_s29, [#allocation6]  }
  0x59   :  { %s623_s19 = scalar_lea.hbm %s880_s4, 16 }
  0x5a   :  { %p624_p12 = scmp.ne.s32.totalorder %s880_s4, %s623_s19  ;;  %p627_p13 = scmp.lt.u32.totalorder %s623_s19, %s880_s4 }
  0x5c   :  { %p629_p0 = pnand %p627_p13, %p624_p12 }
  0x5e   :  { %632 = shalt.err (!%p629_p0)
}
  0x5f   :  { %s633_s25 = scalar_lea.vmem %s68_s9, 16  ;;  %s637_s24 = scalar_lea.vmem %s68_s9, 32 }
  0x60   :  { %p634_p1 = scmp.ne.s32.totalorder %s68_s9, %s633_s25  ;;  %p638_p2 = scmp.lt.s32.totalorder %s68_s9, %s68_s9 }
  0x61   :  { %p639_p3 = scmp.lt.s32.totalorder %s637_s24, %s633_s25 }
  0x63   :  { %p640_p4 = por %p639_p3, %p638_p2 }
  0x65   :  { %p641_p5 = pnand %p640_p4, %p634_p1 }
  0x67   :  { %644 = shalt.err (!%p641_p5)
}
  0x68   :  { %70 = dma.hbm_to_vmem [thread:$0]  %s880_s4, 16, %s68_s9, [#allocation9]  }
  0x69   :  { %s709_s28 = smov [#allocation13]   ;;  %s645_s11 = scalar_lea.hbm %s882_s6, 16 }
  0x6a   :  { %s89_s29 = sshll.u32 %s709_s28, 4  ;;  %p646_p6 = scmp.ne.s32.totalorder %s882_s6, %s645_s11  ;;  %s90_s29 = int_to_ptr.vmem [resolvable:$true] %s89_s29 }
  0x6b   :  { %p649_p7 = scmp.lt.u32.totalorder %s645_s11, %s882_s6 }
  0x6d   :  { %p651_p8 = pnand %p649_p7, %p646_p6 }
  0x6f   :  { %654 = shalt.err (!%p651_p8)
}
  0x70   :  { %s655_s3 = scalar_lea.vmem %s90_s29, 16  ;;  %s659_s4 = scalar_lea.vmem %s90_s29, 32 }
  0x71   :  { %p656_p9 = scmp.ne.s32.totalorder %s90_s29, %s655_s3  ;;  %p660_p10 = scmp.lt.s32.totalorder %s90_s29, %s90_s29 }
  0x72   :  { %p661_p11 = scmp.lt.s32.totalorder %s659_s4, %s655_s3 }
  0x74   :  { %p662_p12 = por %p661_p11, %p660_p10 }
  0x76   :  { %p663_p13 = pnand %p662_p12, %p656_p9 }
  0x78   :  { %666 = shalt.err (!%p663_p13)
}
  0x79   :  { %92 = dma.hbm_to_vmem [thread:$0]  %s882_s6, 16, %s90_s29, [#allocation12]  }
  0x7a   :  { %689 = dma.done.wait [#allocation3], 256  }
  0x7b   :  { %690 = vsyncadd [#allocation3], 4294967040 }
  0x7c   :  { %691 = dma.done.wait [#allocation6], 32  }
  0x7d   :  { %692 = vsyncadd [#allocation6], 4294967264 }
  0x7e   :  { %693 = dma.done.wait [#allocation9], 272  }
  0x7f   :  { %694 = vsyncadd [#allocation9], 4294967024 }
  0x80   :  { %695 = dma.done.wait [#allocation12], 1040  }
  0x81   :  { %696 = vsyncadd [#allocation12], 4294966256  ;;  %vm117_vm0 = vcmask 261120   ;;  %v115_v0 = vld [vmem:[#allocation2] sm:$0xff]  ;;  %v116_v1 = vld [vmem:[#allocation2 + $0x8] sm:$0xff]  ;;  %v710_v15 = vmov 0.0  }
  0x82   :  { %v118_v2 = vsel %vm117_vm0, %v115_v0, 0.0  ;;  %v121_v3 = vsel %vm117_vm0, %v116_v1, 0.0  ;;  %v491_v14 = vld [vmem:[#allocation8] sm:$0xff]   ;;  %449 = vmatprep.subr.bf16.mxu0 %v710_v15  ;;  %457 = vmatprep.subr.bf16.mxu1 %v710_v15  ;;  %v492_v16 = vld [vmem:[#allocation8 + $0x8] sm:$0xff]   ;;  %vm711_vm1 = vmmov 0   ;;  %v493_v34 = vld [vmem:[#allocation11] sm:$0xff]  }
  0x83   :  { %119 = vadd.xlane.f32.xlu0 %v118_v2  ;;  %450 = vmatpush3.bf16.msra.mxu0 %v491_v14  ;;  %v418_v25 = vld [vmem:[#allocation5] ss:$0 sm:$0xff]  ;;  %v419_v29 = vld [vmem:[#allocation7] ss:$0 sm:$0xff]  ;;  %v495_v36 = vld [vmem:[#allocation11 + $0x10] sm:$0xff]   ;;  %s712_s6 = smov [#allocation14]  }
  0x84   :  { %453 = vmatprep.mubr.msk.bf16.mxu0 %vm711_vm1, %v710_v15  ;;  %451 = vmatprep.subr.bf16.mxu0 %v710_v15  ;;  %v494_v35 = vld [vmem:[#allocation11 + $0x8] sm:$0xff]   ;;  %v496_v37 = vld [vmem:[#allocation11 + $0x18] sm:$0xff]   ;;  %v497_v38 = vld [vmem:[#allocation11 + $0x20] sm:$0xff]   ;;  %s403_s8 = sshll.u32 %s712_s6, 4  ;;  %s404_s8 = int_to_ptr.vmem [resolvable:$true] %s403_s8 }
  0x85   :  { %473 = vmatprep.mubr.msk.bf16.mxu1 %vm711_vm1, %v710_v15  ;;  %458 = vmatpush3.bf16.msra.mxu1 %v493_v34  ;;  %v498_v39 = vld [vmem:[#allocation11 + $0x28] sm:$0xff]   ;;  %v499_v40 = vld [vmem:[#allocation11 + $0x30] sm:$0xff]   ;;  %v500_v41 = vld [vmem:[#allocation11 + $0x38] sm:$0xff]   ;;  %s667_s27 = scalar_lea.vmem %s404_s8, 256  ;;  %p672_p1 = scmp.lt.s32.totalorder %s404_s8, %s404_s8 }
  0x86   :  { %459 = vmatprep.subr.bf16.mxu1 %v710_v15  ;;  %v420_v42 = vld [vmem:[#allocation10] ss:$0 sm:$0xff]  ;;  %p668_p0 = scmp.ne.s32.totalorder %s404_s8, %s667_s27  ;;  %p673_p2 = scmp.lt.s32.totalorder %s667_s27, %s667_s27 }
  0x87   :  { %122 = vadd.xlane.f32.xlu0 %v121_v3  ;;  %452 = vmatpush3.bf16.msra.mxu0 %v492_v16 }
  0x88   :  { %p674_p3 = por %p673_p2, %p672_p1 }
  0x89   :  { %460 = vmatpush3.bf16.msra.mxu1 %v494_v35 }
  0x8a   :  { %461 = vmatprep.subr.bf16.mxu1 %v710_v15  ;;  %p675_p4 = pnand %p674_p3, %p668_p0 }
  0x8d   :  { %462 = vmatpush3.bf16.msra.mxu1 %v495_v36  ;;  %v428_v36 = vld [vmem:[#allocation13] ss:$0 sm:$0xff] }
  0x8e   :  { %463 = vmatprep.subr.bf16.mxu1 %v710_v15 }
  0x91   :  { %464 = vmatpush3.bf16.msra.mxu1 %v496_v37 }
  0x92   :  { %465 = vmatprep.subr.bf16.mxu1 %v710_v15 }
  0x95   :  { %466 = vmatpush3.bf16.msra.mxu1 %v497_v38 }
  0x96   :  { %467 = vmatprep.subr.bf16.mxu1 %v710_v15 }
  0x99   :  { %468 = vmatpush3.bf16.msra.mxu1 %v498_v39 }
  0x9a   :  { %469 = vmatprep.subr.bf16.mxu1 %v710_v15 }
  0x9d   :  { %470 = vmatpush3.bf16.msra.mxu1 %v499_v40 }
  0x9e   :  { %471 = vmatprep.subr.bf16.mxu1 %v710_v15 }
  0xa1   :  { %472 = vmatpush3.bf16.msra.mxu1 %v500_v41 }
 0x110   :  { %v120_v4 = vpop.xlane.xlu0 %119 }
 0x111   :  { %v125_v5 = vmul.f32 0.03125, %v120_v4 }
 0x113   :  { %v127_v6 = vsub.f32 %v115_v0, %v125_v5 }
 0x114   :  { %v123_v7 = vpop.xlane.xlu0 %122 }
 0x115   :  { %v126_v8 = vmul.f32 0.03125, %v123_v7  ;;  %v129_v9 = vmul.f32 %v127_v6, %v127_v6 }
 0x117   :  { %v128_v10 = vsub.f32 %v116_v1, %v126_v8  ;;  %v131_v11 = vsel %vm117_vm0, %v129_v9, 0.0 }
 0x118   :  { %132 = vadd.xlane.f32.xlu1 %v131_v11 }
 0x119   :  { %v130_v12 = vmul.f32 %v128_v10, %v128_v10 }
 0x11b   :  { %v134_v13 = vsel %vm117_vm0, %v130_v12, 0.0 }
 0x11c   :  { %135 = vadd.xlane.f32.xlu1 %v134_v13 }
 0x1a5   :  { %v133_v17 = vpop.xlane.xlu1 %132 }
 0x1a6   :  { %v137_v18 = vmul.f32 0.03125, %v133_v17 }
 0x1a8   :  { %v139_v19 = vadd.f32 1e-05, %v137_v18 }
 0x1a9   :  { %v136_v20 = vpop.xlane.xlu1 %135 }
 0x1aa   :  { %501 = vrsqrt.f32 %v139_v19  ;;  %v138_v21 = vmul.f32 0.03125, %v136_v20 }
 0x1ac   :  { %v140_v22 = vadd.f32 1e-05, %v138_v21 }
 0x1ae   :  { %503 = vrsqrt.f32 %v140_v22 }
 0x1b4   :  { %v502_v23 = vpop.eup %501 }
 0x1b5   :  { %v143_v24 = vmul.f32 %v502_v23, %v127_v6 }
 0x1b7   :  { %v152_v28 = vmul.f32 %v418_v25, %v143_v24 }
 0x1b8   :  { %v504_v26 = vpop.eup %503 }
 0x1b9   :  { %v144_v27 = vmul.f32 %v504_v26, %v128_v10  ;;  %v161_v31 = vadd.f32 %v419_v29, %v152_v28 }
 0x1bb   :  { %v153_v30 = vmul.f32 %v418_v25, %v144_v27 }
 0x1bd   :  { %v162_v32 = vadd.f32 %v419_v29, %v153_v30 }
 0x1bf   :  { %v163_v33 = vpack.c.bf16 %v162_v32, %v161_v31 }
 0x1c1   :  { %454 = vmatmul.mubr.msk.bf16.vlgmr.msra.gmra.mrb[0].mxu0 %vm117_vm0, %v163_v33 }
 0x294   :  { %v224_v43 = vpop.f32.mrb[0].mxu0 }
 0x295   :  { %v225_v44 = vadd.f32 %v420_v42, %v224_v43  ;;  %v455_v45 = vpop.f32.mrb[1].mxu0 }
 0x296   :  { %v227_v46 = vpop.f32.mrb[2].mxu0 }
 0x297   :  { %v231_v47 = vmul.f32 0.70710677, %v225_v44  ;;  %v228_v48 = vadd.f32 %v420_v42, %v227_v46  ;;  %v456_v49 = vpop.f32.mrb[3].mxu0  ;;  %v277_v30 = vmul.f32 0.5, %v225_v44 }
 0x299   :  { %v233_v50 = vand.u32 2147483647, %v231_v47  ;;  %v232_v51 = vmul.f32 0.70710677, %v228_v48  ;;  %vm271_vm2 = vcmp.lt.f32.partialorder %v231_v47, 0.0  ;;  %v278_v31 = vmul.f32 0.5, %v228_v48 }
 0x29b   :  { %v235_v52 = vmul.f32 0.3275911, %v233_v50  ;;  %v234_v53 = vand.u32 2147483647, %v232_v51  ;;  %v259_v57 = vsub.f32 0.0, %v233_v50  ;;  %vm272_vm3 = vcmp.lt.f32.partialorder %v232_v51, 0.0 }
 0x29d   :  { %v237_v54 = vadd.f32 1.0, %v235_v52  ;;  %v236_v55 = vmul.f32 0.3275911, %v234_v53  ;;  %v260_v58 = vsub.f32 0.0, %v234_v53  ;;  %v261_v60 = vmul.f32 %v259_v57, %v233_v50 }
 0x29f   :  { %505 = vrcp.f32 %v237_v54  ;;  %v238_v56 = vadd.f32 1.0, %v236_v55  ;;  %v262_v0 = vmul.f32 %v260_v58, %v234_v53  ;;  %v263_v1 = vmul.f32 1.442695, %v261_v60 }
 0x2a1   :  { %507 = vrcp.f32 %v238_v56  ;;  %v265_v6 = vmul.f32 1.442695, %v262_v0 }
 0x2a2   :  { %509 = vpow2.f32 %v263_v1 }
 0x2a3   :  { %511 = vpow2.f32 %v265_v6 }
 0x2a9   :  { %v506_v59 = vpop.eup %505 }
 0x2aa   :  { %v241_v61 = vmul.f32 1.0614054, %v506_v59 }
 0x2ab   :  { %v508_v62 = vpop.eup %507 }
 0x2ac   :  { %v424_v63 = vadd.f32 -1.4531521, %v241_v61  ;;  %v242_v2 = vmul.f32 1.0614054, %v508_v62  ;;  %v510_v17 = vpop.eup %509 }
 0x2ad   :  { %v512_v21 = vpop.eup %511 }
 0x2ae   :  { %v245_v3 = vmul.f32 %v506_v59, %v424_v63  ;;  %v425_v4 = vadd.f32 -1.4531521, %v242_v2 }
 0x2b0   :  { %v247_v5 = vadd.f32 1.4214138, %v245_v3  ;;  %v246_v7 = vmul.f32 %v508_v62, %v425_v4 }
 0x2b2   :  { %v249_v8 = vmul.f32 %v506_v59, %v247_v5  ;;  %v248_v9 = vadd.f32 1.4214138, %v246_v7 }
 0x2b4   :  { %v426_v10 = vadd.f32 -0.28449672, %v249_v8  ;;  %v250_v11 = vmul.f32 %v508_v62, %v248_v9 }
 0x2b6   :  { %v253_v12 = vmul.f32 %v506_v59, %v426_v10  ;;  %v427_v13 = vadd.f32 -0.28449672, %v250_v11 }
 0x2b8   :  { %v255_v14 = vadd.f32 0.2548296, %v253_v12  ;;  %v254_v15 = vmul.f32 %v508_v62, %v427_v13 }
 0x2ba   :  { %v257_v16 = vmul.f32 %v506_v59, %v255_v14  ;;  %v256_v18 = vadd.f32 0.2548296, %v254_v15 }
 0x2bc   :  { %v267_v19 = vmul.f32 %v510_v17, %v257_v16  ;;  %v258_v20 = vmul.f32 %v508_v62, %v256_v18 }
 0x2be   :  { %v269_v22 = vsub.f32 1.0, %v267_v19  ;;  %v268_v23 = vmul.f32 %v512_v21, %v258_v20 }
 0x2c0   :  { %v273_v24 = vsub.f32 0.0, %v269_v22  ;;  %v270_v25 = vsub.f32 1.0, %v268_v23 }
 0x2c2   :  { %v275_v26 = vsel %vm271_vm2, %v273_v24, %v269_v22  ;;  %v274_v27 = vsub.f32 0.0, %v270_v25 }
 0x2c3   :  { %v279_v28 = vadd.f32 1.0, %v275_v26 }
 0x2c4   :  { %v276_v29 = vsel %vm272_vm3, %v274_v27, %v270_v25 }
 0x2c5   :  { %v280_v32 = vadd.f32 1.0, %v276_v29  ;;  %v281_v33 = vmul.f32 %v279_v28, %v277_v30 }
 0x2c7   :  { %v282_v34 = vmul.f32 %v280_v32, %v278_v31 }
 0x2c9   :  { %v283_v35 = vpack.c.bf16 %v282_v34, %v281_v33 }
 0x2cb   :  { %474 = vmatmul.mubr.bf16.vlgmr.msra.gmra.mrb[0].mxu1 %v283_v35 }
 0x39e   :  { %v389_v37 = vpop.f32.mrb[0].mxu1 }
 0x39f   :  { %v390_v38 = vadd.f32 %v428_v36, %v389_v37  ;;  %v475_v39 = vpop.f32.mrb[1].mxu1 }
 0x3a0   :  { %v392_v40 = vpop.f32.mrb[2].mxu1 }
 0x3a1   :  { %396 = vst.msk [vmem:[#allocation14] sm:$0xff] %vm117_vm0, %v390_v38  ;;  %v393_v41 = vadd.f32 %v428_v36, %v392_v40  ;;  %v476_v42 = vpop.f32.mrb[3].mxu1 }
 0x3a3   :  { %397 = vst.msk [vmem:[#allocation14 + $0x8] sm:$0xff] %vm117_vm0, %v393_v41 }
 0x3a4   :  { %678 = shalt.err (!%p675_p4)
}
 0x3a5   :  { %s679_s18 = scalar_lea.hbm %s883_s7, 256 }
 0x3a6   :  { %p680_p5 = scmp.ne.s32.totalorder %s883_s7, %s679_s18  ;;  %p683_p6 = scmp.lt.u32.totalorder %s679_s18, %s883_s7 }
 0x3a8   :  { %p685_p7 = pnand %p683_p6, %p680_p5 }
 0x3aa   :  { %688 = shalt.err (!%p685_p7)
}
 0x3ab   :  { %409 = dma.vmem_to_hbm [thread:$0]  %s404_s8, 256, %s883_s7, [#allocation4], %s705_s5, %s705_s5, %s706_s1  }
 0x3ac   :  { %697 = dma.done.wait [#allocation4], 256  }
 0x3ad   :  { %698 = vsyncadd [#allocation4], 4294967040 }
 0x3ae   :  { %413 = vsyncpa [#allocation3], 1 }
 0x3af   :  { %414 = vsyncpa [#allocation6], 1 }
 0x3b0   :  { %415 = vsyncpa [#allocation9], 1 }
 0x3b1   :  { %416 = vsyncpa [#allocation12], 1 }
 0x3b2   :  { %417 = vsyncpa [#allocation4], 1 }

</bundles_post_ra>
